<compile_context>
chip_gen: v7x
topology: tpu7x:2x2x1
jax: 0.10.0
libtpu: 0.0.40
codegen_flags: <defaults>
</compile_context>

<pallas_src>
import functools
import numpy as np
import jax
import jax.numpy as jnp
from jax.experimental import pallas as pl
from jax.experimental.pallas import tpu as pltpu

try:  # fast host-side Hungarian if available
    from scipy.optimize import linear_sum_assignment as _scipy_lsa
except Exception:  # pragma: no cover
    _scipy_lsa = None


def _round_up(x, m):
    return ((x + m - 1) // m) * m


# ----------------------------- Pallas kernel --------------------------------
def _cost_kernel(logits_ref, boxes_ref, onehot_ref, tgt_boxes_t_ref, c_ref,
                 *, w_class, w_bbox, w_giou):
    logits = logits_ref[...].astype(jnp.float32)          # (tn, Cp)
    pbox = boxes_ref[...].astype(jnp.float32)             # (tn, 4)
    onehot = onehot_ref[...]                               # (Tp, Cp) bf16
    tbox = tgt_boxes_t_ref[...].astype(jnp.float32)        # (4, Tp)  lane-dense rows

    # ---- softmax numerator; normalization folded into the cost via EUP reciprocal ----
    m = jnp.max(logits, axis=-1, keepdims=True)
    e = jnp.exp(logits - m)                                # (tn, Cp)
    inv_sum = pl.reciprocal(jnp.sum(e, axis=-1, keepdims=True), approx=True)  # (tn, 1)

    # ---- classification cost: -(e @ onehot^T) * inv_sum  == -prob[:, tgt_ids] (MXU, bf16) ----
    edot = jax.lax.dot_general(
        e.astype(jnp.bfloat16), onehot,
        dimension_numbers=(((1,), (1,)), ((), ())),
        preferred_element_type=jnp.float32)                # (tn, Tp)

    # ---- per-coordinate views: preds as (tn,1) columns, targets as (1,Tp) rows ----
    pcx, pcy, pw, ph = pbox[:, 0:1], pbox[:, 1:2], pbox[:, 2:3], pbox[:, 3:4]
    tcx, tcy, tw, th = tbox[0:1, :], tbox[1:2, :], tbox[2:3, :], tbox[3:4, :]

    # ---- L1 cdist, accumulated straight into the running output tile ----
    c = w_bbox * (jnp.abs(pcx - tcx) + jnp.abs(pcy - tcy)
                  + jnp.abs(pw - tw) + jnp.abs(ph - th))   # (tn, Tp)
    c = c - w_class * (edot * inv_sum)

    # ---- generalized IoU cost (pairwise), cxcywh -> xyxy ----
    px0, py0, px1, py1 = pcx - 0.5 * pw, pcy - 0.5 * ph, pcx + 0.5 * pw, pcy + 0.5 * ph
    tx0, ty0, tx1, ty1 = tcx - 0.5 * tw, tcy - 0.5 * th, tcx + 0.5 * tw, tcy + 0.5 * th
    area_p = (px1 - px0) * (py1 - py0)                     # (tn, 1)
    area_t = (tx1 - tx0) * (ty1 - ty0)                     # (1, Tp)

    ix0 = jnp.maximum(px0, tx0)
    iy0 = jnp.maximum(py0, ty0)
    ix1 = jnp.minimum(px1, tx1)
    iy1 = jnp.minimum(py1, ty1)
    inter = jnp.maximum(ix1 - ix0, 0.0) * jnp.maximum(iy1 - iy0, 0.0)   # (tn, Tp)
    union = area_p + area_t - inter
    iou = inter * pl.reciprocal(union, approx=True)

    cx0 = jnp.minimum(px0, tx0)
    cy0 = jnp.minimum(py0, ty0)
    cx1 = jnp.maximum(px1, tx1)
    cy1 = jnp.maximum(py1, ty1)
    area_c = jnp.maximum(cx1 - cx0, 0.0) * jnp.maximum(cy1 - cy0, 0.0)
    giou = iou - (area_c - union) * pl.reciprocal(area_c, approx=True)

    c = c - w_giou * giou
    c_ref[...] = c.astype(c_ref.dtype)


def compute_cost_matrix(pred_logits, pred_boxes, tgt_labels, tgt_boxes,
                        cost_class=1.0, cost_bbox=1.0, cost_giou=1.0):
    """Returns C with shape (bs, num_queries, num_total_targets), float32."""
    bs, nq, nc = pred_logits.shape
    N = bs * nq
    T = int(tgt_boxes.shape[0])
    if T == 0:  # no targets in the whole batch
        return jnp.zeros((bs, nq, 0), jnp.float32)

    C_pad = max(128, _round_up(nc, 128))
    T_pad = max(128, _round_up(T, 128))
    TILE_N = min(256, _round_up(N, 8))      # row tile; fits comfortably in VMEM on v5e/v6e/v7x
    N_pad = _round_up(N, TILE_N)

    # logits: keep native dtype (bf16 stays bf16 -> half the HBM bytes); pad classes with a very
    # negative constant so exp() of the padding is exactly 0; pad rows with zeros.
    logits_flat = pred_logits.reshape(N, nc)
    if C_pad > nc:
        logits_flat = jnp.pad(logits_flat, ((0, 0), (0, C_pad - nc)), constant_values=-1e9)
    if N_pad > N:
        logits_flat = jnp.pad(logits_flat, ((0, N_pad - N), (0, 0)))

    boxes_flat = pred_boxes.reshape(N, 4).astype(jnp.float32)
    if N_pad > N:
        dummy = jnp.tile(jnp.array([[0.5, 0.5, 1.0, 1.0]], jnp.float32), (N_pad - N, 1))
        boxes_flat = jnp.concatenate([boxes_flat, dummy], axis=0)

    # one-hot targets in bf16 (exact); pad with zero rows so padded columns get cost_class = 0.
    onehot = jax.nn.one_hot(tgt_labels, C_pad, dtype=jnp.bfloat16)      # (T, C_pad)
    tgt_boxes_f = tgt_boxes.astype(jnp.float32)
    if T_pad > T:
        onehot = jnp.pad(onehot, ((0, T_pad - T), (0, 0)))
        dummy_t = jnp.tile(jnp.array([[0.5, 0.5, 1.0, 1.0]], jnp.float32), (T_pad - T, 1))
        tgt_boxes_f = jnp.concatenate([tgt_boxes_f, dummy_t], axis=0)
    tgt_boxes_t = tgt_boxes_f.T                                         # (4, T_pad)

    kernel = functools.partial(_cost_kernel,
                               w_class=float(cost_class),
                               w_bbox=float(cost_bbox),
                               w_giou=float(cost_giou))

    grid = (N_pad // TILE_N,)
    C_full = pl.pallas_call(
        kernel,
        out_shape=jax.ShapeDtypeStruct((N_pad, T_pad), jnp.float32),
        grid=grid,
        in_specs=[
            pl.BlockSpec((TILE_N, C_pad), lambda i: (i, 0)),   # logits: row-tiled
            pl.BlockSpec((TILE_N, 4), lambda i: (i, 0)),       # pred boxes: row-tiled
            pl.BlockSpec((T_pad, C_pad), lambda i: (0, 0)),    # one-hot: full, reused each step
            pl.BlockSpec((4, T_pad), lambda i: (0, 0)),        # tgt boxes^T: full, reused
        ],
        out_specs=pl.BlockSpec((TILE_N, T_pad), lambda i: (i, 0)),
        compiler_params=pltpu.CompilerParams(
            dimension_semantics=("parallel",)),                # megacore sharding on v7x
    )(logits_flat, boxes_flat, onehot, tgt_boxes_t)

    return C_full[:N, :T].reshape(bs, nq, T)


# ------------------- host-side Hungarian (linear_sum_assignment) -------------
# TODO(synk): the Hungarian assignment is an inherently sequential, data-dependent
# augmenting-path algorithm with no clean Pallas equivalent; it runs on host
# (scipy if available, else a pure-numpy Jonker-Volgenant-style fallback).
def _linear_sum_assignment_np(cost):
    cost = np.asarray(cost, dtype=np.float64)
    n_rows, n_cols = cost.shape
    if n_rows == 0 or n_cols == 0:
        return np.zeros((0,), np.int64), np.zeros((0,), np.int64)
    transposed = False
    if n_rows > n_cols:
        cost = cost.T
        n_rows, n_cols = cost.shape
        transposed = True
    n, mcols = n_rows, n_cols
    u = np.zeros(n + 1)
    v = np.zeros(mcols + 1)
    p = np.zeros(mcols + 1, dtype=np.int64)
    way = np.zeros(mcols + 1, dtype=np.int64)
    for i in range(1, n + 1):
        p[0] = i
        j0 = 0
        minv = np.full(mcols + 1, np.inf)
        used = np.zeros(mcols + 1, dtype=bool)
        while True:
            used[j0] = True
            i0 = p[j0]
            delta = np.inf
            j1 = 0
            for j in range(1, mcols + 1):
                if not used[j]:
                    cur = cost[i0 - 1, j - 1] - u[i0] - v[j]
                    if cur < minv[j]:
                        minv[j] = cur
                        way[j] = j0
                    if minv[j] < delta:
                        delta = minv[j]
                        j1 = j
            for j in range(mcols + 1):
                if used[j]:
                    u[p[j]] += delta
                    v[j] -= delta
                else:
                    minv[j] -= delta
            j0 = j1
            if p[j0] == 0:
                break
        while True:
            j1 = way[j0]
            p[j0] = p[j1]
            j0 = j1
            if j0 == 0:
                break
    row_of_col = p[1:]
    rows, cols = [], []
    for j in range(mcols):
        if row_of_col[j] != 0:
            rows.append(row_of_col[j] - 1)
            cols.append(j)
    rows = np.asarray(rows, dtype=np.int64)
    cols = np.asarray(cols, dtype=np.int64)
    if transposed:
        rows, cols = cols, rows
    order = np.argsort(rows)
    return rows[order], cols[order]


def linear_sum_assignment_host(cost):
    if _scipy_lsa is not None:
        r, c = _scipy_lsa(np.asarray(cost))
        return np.asarray(r, np.int64), np.asarray(c, np.int64)
    return _linear_sum_assignment_np(cost)


# ------------------------------ matcher module -------------------------------
class HungarianMatcher:
    def __init__(self, cost_class: float = 1, cost_bbox: float = 1, cost_giou: float = 1):
        self.cost_class = cost_class
        self.cost_bbox = cost_bbox
        self.cost_giou = cost_giou
        assert cost_class != 0 or cost_bbox != 0 or cost_giou != 0, "all costs cant be 0"

    def forward(self, outputs, targets):
        pred_logits = outputs["pred_logits"]
        pred_boxes = outputs["pred_boxes"]
        bs, num_queries = pred_logits.shape[:2]
        sizes = [int(v["boxes"].shape[0]) for v in targets]

        if sum(sizes) == 0:  # no targets anywhere -> empty matches
            empty = np.zeros((0,), np.int64)
            return [(empty, empty) for _ in range(bs)]

        tgt_ids = jnp.concatenate([v["labels"] for v in targets], axis=0)
        tgt_bbox = jnp.concatenate([v["boxes"] for v in targets], axis=0)

        C = compute_cost_matrix(pred_logits, pred_boxes, tgt_ids, tgt_bbox,
                                self.cost_class, self.cost_bbox, self.cost_giou)
        C = jax.block_until_ready(C)
        C_np = np.asarray(C)  # (bs, num_queries, total_targets) — padded cols already removed

        indices = []
        off = 0
        for i, s in enumerate(sizes):
            sub = C_np[i, :, off:off + s]
            indices.append(linear_sum_assignment_host(sub))
            off += s
        return [(np.asarray(r, dtype=np.int64), np.asarray(c, dtype=np.int64))
                for r, c in indices]

    __call__ = forward


# ------------------------------ reference check ------------------------------
def _ref_cost_matrix(pred_logits, pred_boxes, tgt_labels, tgt_boxes, wc, wb, wg):
    nc = pred_logits.shape[-1]
    prob = jax.nn.softmax(pred_logits.reshape(-1, nc).astype(jnp.float32), axis=-1)
    out_bbox = pred_boxes.reshape(-1, 4).astype(jnp.float32)
    cost_class = -prob[:, tgt_labels]
    cost_bbox = jnp.sum(jnp.abs(out_bbox[:, None, :] - tgt_boxes[None, :, :]), -1)

    def to_xyxy(b):
        cx, cy, w, h = jnp.split(b, 4, axis=-1)
        return jnp.concatenate([cx - 0.5 * w, cy - 0.5 * h, cx + 0.5 * w, cy + 0.5 * h], -1)

    b1, b2 = to_xyxy(out_bbox), to_xyxy(tgt_boxes)
    area1 = (b1[:, 2] - b1[:, 0]) * (b1[:, 3] - b1[:, 1])
    area2 = (b2[:, 2] - b2[:, 0]) * (b2[:, 3] - b2[:, 1])
    lt = jnp.maximum(b1[:, None, :2], b2[None, :, :2])
    rb = jnp.minimum(b1[:, None, 2:], b2[None, :, 2:])
    wh = jnp.clip(rb - lt, 0.0)
    inter = wh[..., 0] * wh[..., 1]
    union = area1[:, None] + area2[None, :] - inter
    iou = inter / union
    ltc = jnp.minimum(b1[:, None, :2], b2[None, :, :2])
    rbc = jnp.maximum(b1[:, None, 2:], b2[None, :, 2:])
    whc = jnp.clip(rbc - ltc, 0.0)
    areac = whc[..., 0] * whc[..., 1]
    giou = iou - (areac - union) / areac
    return wb * cost_bbox + wc * cost_class + wg * (-giou)


if __name__ == "__main__":
    key = jax.random.PRNGKey(0)
    bs, num_queries, num_classes = 2, 8, 16
    sizes = [3, 4]  # ground-truth boxes per batch element
    k1, k2, k3, k4 = jax.random.split(key, 4)

    pred_logits = jax.random.normal(k1, (bs, num_queries, num_classes), jnp.float32)
    pred_boxes = jax.nn.sigmoid(jax.random.normal(k2, (bs, num_queries, 4), jnp.float32))
    tgt_labels_all = jax.random.randint(k3, (sum(sizes),), 0, num_classes)
    tgt_boxes_all = jax.nn.sigmoid(jax.random.normal(k4, (sum(sizes), 4), jnp.float32))

    targets = []
    off = 0
    for s in sizes:
        targets.append({"labels": tgt_labels_all[off:off + s],
                        "boxes": tgt_boxes_all[off:off + s]})
        off += s
    outputs = {"pred_logits": pred_logits, "pred_boxes": pred_boxes}

    matcher = HungarianMatcher(cost_class=1.0, cost_bbox=1.0, cost_giou=1.0)

    # Pallas cost matrix vs pure-JAX reference (bf16 class matmul + approx EUP reciprocals
    # introduce ~1e-3 level differences, so use a matching-appropriate tolerance).
    C_kernel = compute_cost_matrix(pred_logits, pred_boxes, tgt_labels_all, tgt_boxes_all)
    C_kernel = jax.block_until_ready(C_kernel)
    C_ref = _ref_cost_matrix(pred_logits, pred_boxes, tgt_labels_all, tgt_boxes_all,
                             1.0, 1.0, 1.0).reshape(bs, num_queries, sum(sizes))
    assert np.allclose(np.asarray(C_kernel), np.asarray(C_ref), atol=3e-2, rtol=3e-2), \
        "cost matrix mismatch"

    indices = matcher(outputs, targets)
    for (i_idx, j_idx), s in zip(indices, sizes):
        assert len(i_idx) == len(j_idx) == min(num_queries, s)

    print("KERNEL_OK")
</pallas_src>

<mosaic_0001>
module attributes {stable_mosaic.version = 11 : i64} {
  func.func @_cost_kernel(%arg0: i32, %arg1: memref<16x128xf32, #tpu.memory_space<vmem>>, %arg2: memref<16x4xf32, #tpu.memory_space<vmem>>, %arg3: memref<128x128xbf16, #tpu.memory_space<vmem>>, %arg4: memref<4x128xf32, #tpu.memory_space<vmem>>, %arg5: memref<16x128xf32, #tpu.memory_space<vmem>>) attributes {dimension_semantics = [#tpu.dimension_semantics<parallel>], iteration_bounds = array<i64: 1>, scalar_prefetch = 0 : i64, scratch_operands = 0 : i64, tpu.core_type = #tpu.core_type<tc>, window_params = [{transform_indices = @transform_0, window_bounds = array<i64: 16, 128>}, {transform_indices = @transform_1, window_bounds = array<i64: 16, 4>}, {pipeline_mode = #tpu.pipeline_mode<synchronous>, transform_indices = @transform_2, window_bounds = array<i64: 128, 128>}, {pipeline_mode = #tpu.pipeline_mode<synchronous>, transform_indices = @transform_3, window_bounds = array<i64: 4, 128>}, {transform_indices = @transform_4, window_bounds = array<i64: 16, 128>}]} {
    %c0 = arith.constant 0 : index
    %c0_0 = arith.constant 0 : index
    %0 = vector.load %arg1[%c0, %c0_0] : memref<16x128xf32, #tpu.memory_space<vmem>>, vector<16x128xf32>
    %c0_1 = arith.constant 0 : index
    %c0_2 = arith.constant 0 : index
    %1 = vector.load %arg2[%c0_1, %c0_2] : memref<16x4xf32, #tpu.memory_space<vmem>>, vector<16x4xf32>
    %c0_3 = arith.constant 0 : index
    %c0_4 = arith.constant 0 : index
    %2 = vector.load %arg3[%c0_3, %c0_4] : memref<128x128xbf16, #tpu.memory_space<vmem>>, vector<128x128xbf16>
    %c0_5 = arith.constant 0 : index
    %c0_6 = arith.constant 0 : index
    %3 = vector.load %arg4[%c0_5, %c0_6] : memref<4x128xf32, #tpu.memory_space<vmem>>, vector<4x128xf32>
    %cst = arith.constant dense<0xFF800000> : vector<16xf32>
    %4 = vector.multi_reduction <maximumf>, %0, %cst [1] : vector<16x128xf32> to vector<16xf32>
    %5 = vector.shape_cast %4 : vector<16xf32> to vector<16x1xf32>
    %6 = vector.broadcast %5 : vector<16x1xf32> to vector<16x128xf32>
    %7 = arith.subf %0, %6 : vector<16x128xf32>
    %8 = math.exp %7 : vector<16x128xf32>
    %cst_7 = arith.constant dense<0.000000e+00> : vector<16xf32>
    %9 = vector.multi_reduction <add>, %8, %cst_7 [1] : vector<16x128xf32> to vector<16xf32>
    %10 = vector.shape_cast %9 : vector<16xf32> to vector<16x1xf32>
    %11 = tpu.reciprocal %10 {approx = true} : vector<16x1xf32> -> vector<16x1xf32>
    %12 = arith.truncf %8 : vector<16x128xf32> to vector<16x128xbf16>
    %cst_8 = arith.constant dense<0.000000e+00> : vector<16x128xf32>
    %13 = tpu.matmul %12, %2, %cst_8 {dimension_numbers = #tpu.dot_dimension_numbers<[1], [1], [0], [0], [0, 0, 1, 0], [], []>} : vector<16x128xbf16>, vector<128x128xbf16>, vector<16x128xf32> -> vector<16x128xf32>
    %14 = vector.extract_strided_slice %1 {offsets = [0, 0], sizes = [16, 1], strides = [1, 1]} : vector<16x4xf32> to vector<16x1xf32>
    %15 = vector.extract_strided_slice %1 {offsets = [0, 1], sizes = [16, 1], strides = [1, 1]} : vector<16x4xf32> to vector<16x1xf32>
    %16 = vector.extract_strided_slice %1 {offsets = [0, 2], sizes = [16, 1], strides = [1, 1]} : vector<16x4xf32> to vector<16x1xf32>
    %17 = vector.extract_strided_slice %1 {offsets = [0, 3], sizes = [16, 1], strides = [1, 1]} : vector<16x4xf32> to vector<16x1xf32>
    %18 = vector.extract_strided_slice %3 {offsets = [0, 0], sizes = [1, 128], strides = [1, 1]} : vector<4x128xf32> to vector<1x128xf32>
    %19 = vector.extract_strided_slice %3 {offsets = [1, 0], sizes = [1, 128], strides = [1, 1]} : vector<4x128xf32> to vector<1x128xf32>
    %20 = vector.extract_strided_slice %3 {offsets = [2, 0], sizes = [1, 128], strides = [1, 1]} : vector<4x128xf32> to vector<1x128xf32>
    %21 = vector.extract_strided_slice %3 {offsets = [3, 0], sizes = [1, 128], strides = [1, 1]} : vector<4x128xf32> to vector<1x128xf32>
    %22 = vector.broadcast %14 : vector<16x1xf32> to vector<16x128xf32>
    %23 = vector.broadcast %18 : vector<1x128xf32> to vector<16x128xf32>
    %24 = arith.subf %22, %23 : vector<16x128xf32>
    %25 = math.absf %24 : vector<16x128xf32>
    %26 = vector.broadcast %15 : vector<16x1xf32> to vector<16x128xf32>
    %27 = vector.broadcast %19 : vector<1x128xf32> to vector<16x128xf32>
    %28 = arith.subf %26, %27 : vector<16x128xf32>
    %29 = math.absf %28 : vector<16x128xf32>
    %30 = arith.addf %25, %29 : vector<16x128xf32>
    %31 = vector.broadcast %16 : vector<16x1xf32> to vector<16x128xf32>
    %32 = vector.broadcast %20 : vector<1x128xf32> to vector<16x128xf32>
    %33 = arith.subf %31, %32 : vector<16x128xf32>
    %34 = math.absf %33 : vector<16x128xf32>
    %35 = arith.addf %30, %34 : vector<16x128xf32>
    %36 = vector.broadcast %17 : vector<16x1xf32> to vector<16x128xf32>
    %37 = vector.broadcast %21 : vector<1x128xf32> to vector<16x128xf32>
    %38 = arith.subf %36, %37 : vector<16x128xf32>
    %39 = math.absf %38 : vector<16x128xf32>
    %40 = arith.addf %35, %39 : vector<16x128xf32>
    %cst_9 = arith.constant 1.000000e+00 : f32
    %41 = vector.broadcast %cst_9 : f32 to vector<16x128xf32>
    %42 = arith.mulf %41, %40 : vector<16x128xf32>
    %43 = vector.broadcast %11 : vector<16x1xf32> to vector<16x128xf32>
    %44 = arith.mulf %13, %43 : vector<16x128xf32>
    %cst_10 = arith.constant 1.000000e+00 : f32
    %45 = vector.broadcast %cst_10 : f32 to vector<16x128xf32>
    %46 = arith.mulf %45, %44 : vector<16x128xf32>
    %47 = arith.subf %42, %46 : vector<16x128xf32>
    %cst_11 = arith.constant 5.000000e-01 : f32
    %48 = vector.broadcast %cst_11 : f32 to vector<16x1xf32>
    %49 = arith.mulf %48, %16 : vector<16x1xf32>
    %50 = arith.subf %14, %49 : vector<16x1xf32>
    %cst_12 = arith.constant 5.000000e-01 : f32
    %51 = vector.broadcast %cst_12 : f32 to vector<16x1xf32>
    %52 = arith.mulf %51, %17 : vector<16x1xf32>
    %53 = arith.subf %15, %52 : vector<16x1xf32>
    %cst_13 = arith.constant 5.000000e-01 : f32
    %54 = vector.broadcast %cst_13 : f32 to vector<16x1xf32>
    %55 = arith.mulf %54, %16 : vector<16x1xf32>
    %56 = arith.addf %14, %55 : vector<16x1xf32>
    %cst_14 = arith.constant 5.000000e-01 : f32
    %57 = vector.broadcast %cst_14 : f32 to vector<16x1xf32>
    %58 = arith.mulf %57, %17 : vector<16x1xf32>
    %59 = arith.addf %15, %58 : vector<16x1xf32>
    %cst_15 = arith.constant 5.000000e-01 : f32
    %60 = vector.broadcast %cst_15 : f32 to vector<1x128xf32>
    %61 = arith.mulf %60, %20 : vector<1x128xf32>
    %62 = arith.subf %18, %61 : vector<1x128xf32>
    %cst_16 = arith.constant 5.000000e-01 : f32
    %63 = vector.broadcast %cst_16 : f32 to vector<1x128xf32>
    %64 = arith.mulf %63, %21 : vector<1x128xf32>
    %65 = arith.subf %19, %64 : vector<1x128xf32>
    %cst_17 = arith.constant 5.000000e-01 : f32
    %66 = vector.broadcast %cst_17 : f32 to vector<1x128xf32>
    %67 = arith.mulf %66, %20 : vector<1x128xf32>
    %68 = arith.addf %18, %67 : vector<1x128xf32>
    %cst_18 = arith.constant 5.000000e-01 : f32
    %69 = vector.broadcast %cst_18 : f32 to vector<1x128xf32>
    %70 = arith.mulf %69, %21 : vector<1x128xf32>
    %71 = arith.addf %19, %70 : vector<1x128xf32>
    %72 = arith.subf %56, %50 : vector<16x1xf32>
    %73 = arith.subf %59, %53 : vector<16x1xf32>
    %74 = arith.mulf %72, %73 : vector<16x1xf32>
    %75 = arith.subf %68, %62 : vector<1x128xf32>
    %76 = arith.subf %71, %65 : vector<1x128xf32>
    %77 = arith.mulf %75, %76 : vector<1x128xf32>
    %78 = vector.broadcast %50 : vector<16x1xf32> to vector<16x128xf32>
    %79 = vector.broadcast %62 : vector<1x128xf32> to vector<16x128xf32>
    %80 = arith.maximumf %78, %79 : vector<16x128xf32>
    %81 = vector.broadcast %53 : vector<16x1xf32> to vector<16x128xf32>
    %82 = vector.broadcast %65 : vector<1x128xf32> to vector<16x128xf32>
    %83 = arith.maximumf %81, %82 : vector<16x128xf32>
    %84 = vector.broadcast %56 : vector<16x1xf32> to vector<16x128xf32>
    %85 = vector.broadcast %68 : vector<1x128xf32> to vector<16x128xf32>
    %86 = arith.minimumf %84, %85 : vector<16x128xf32>
    %87 = vector.broadcast %59 : vector<16x1xf32> to vector<16x128xf32>
    %88 = vector.broadcast %71 : vector<1x128xf32> to vector<16x128xf32>
    %89 = arith.minimumf %87, %88 : vector<16x128xf32>
    %90 = arith.subf %86, %80 : vector<16x128xf32>
    %cst_19 = arith.constant 0.000000e+00 : f32
    %91 = vector.broadcast %cst_19 : f32 to vector<16x128xf32>
    %92 = arith.maximumf %90, %91 : vector<16x128xf32>
    %93 = arith.subf %89, %83 : vector<16x128xf32>
    %cst_20 = arith.constant 0.000000e+00 : f32
    %94 = vector.broadcast %cst_20 : f32 to vector<16x128xf32>
    %95 = arith.maximumf %93, %94 : vector<16x128xf32>
    %96 = arith.mulf %92, %95 : vector<16x128xf32>
    %97 = vector.broadcast %74 : vector<16x1xf32> to vector<16x128xf32>
    %98 = vector.broadcast %77 : vector<1x128xf32> to vector<16x128xf32>
    %99 = arith.addf %97, %98 : vector<16x128xf32>
    %100 = arith.subf %99, %96 : vector<16x128xf32>
    %101 = tpu.reciprocal %100 {approx = true} : vector<16x128xf32> -> vector<16x128xf32>
    %102 = arith.mulf %96, %101 : vector<16x128xf32>
    %103 = vector.broadcast %50 : vector<16x1xf32> to vector<16x128xf32>
    %104 = vector.broadcast %62 : vector<1x128xf32> to vector<16x128xf32>
    %105 = arith.minimumf %103, %104 : vector<16x128xf32>
    %106 = vector.broadcast %53 : vector<16x1xf32> to vector<16x128xf32>
    %107 = vector.broadcast %65 : vector<1x128xf32> to vector<16x128xf32>
    %108 = arith.minimumf %106, %107 : vector<16x128xf32>
    %109 = vector.broadcast %56 : vector<16x1xf32> to vector<16x128xf32>
    %110 = vector.broadcast %68 : vector<1x128xf32> to vector<16x128xf32>
    %111 = arith.maximumf %109, %110 : vector<16x128xf32>
    %112 = vector.broadcast %59 : vector<16x1xf32> to vector<16x128xf32>
    %113 = vector.broadcast %71 : vector<1x128xf32> to vector<16x128xf32>
    %114 = arith.maximumf %112, %113 : vector<16x128xf32>
    %115 = arith.subf %111, %105 : vector<16x128xf32>
    %cst_21 = arith.constant 0.000000e+00 : f32
    %116 = vector.broadcast %cst_21 : f32 to vector<16x128xf32>
    %117 = arith.maximumf %115, %116 : vector<16x128xf32>
    %118 = arith.subf %114, %108 : vector<16x128xf32>
    %cst_22 = arith.constant 0.000000e+00 : f32
    %119 = vector.broadcast %cst_22 : f32 to vector<16x128xf32>
    %120 = arith.maximumf %118, %119 : vector<16x128xf32>
    %121 = arith.mulf %117, %120 : vector<16x128xf32>
    %122 = arith.subf %121, %100 : vector<16x128xf32>
    %123 = tpu.reciprocal %121 {approx = true} : vector<16x128xf32> -> vector<16x128xf32>
    %124 = arith.mulf %122, %123 : vector<16x128xf32>
    %125 = arith.subf %102, %124 : vector<16x128xf32>
    %cst_23 = arith.constant 1.000000e+00 : f32
    %126 = vector.broadcast %cst_23 : f32 to vector<16x128xf32>
    %127 = arith.mulf %126, %125 : vector<16x128xf32>
    %128 = arith.subf %47, %127 : vector<16x128xf32>
    %c0_24 = arith.constant 0 : index
    %c0_25 = arith.constant 0 : index
    %129 = vector.load %arg5[%c0_24, %c0_25] : memref<16x128xf32, #tpu.memory_space<vmem>>, vector<16x128xf32>
    tpu.vector_store %arg5[%c0_24, %c0_25], %128 {strides = array<i32>} : memref<16x128xf32, #tpu.memory_space<vmem>>, vector<16x128xf32>,
    return
  }
  func.func @transform_0(%arg0: i32) -> (i32, i32) {
    %c0_i32 = arith.constant 0 : i32
    %c0_i32_0 = arith.constant 0 : i32
    return %arg0, %c0_i32 : i32, i32
  }
  func.func @transform_1(%arg0: i32) -> (i32, i32) {
    %c0_i32 = arith.constant 0 : i32
    %c0_i32_0 = arith.constant 0 : i32
    return %arg0, %c0_i32 : i32, i32
  }
  func.func @transform_2(%arg0: i32) -> (i32, i32) {
    %c0_i32 = arith.constant 0 : i32
    %c0_i32_0 = arith.constant 0 : i32
    %c0_i32_1 = arith.constant 0 : i32
    return %c0_i32, %c0_i32_0 : i32, i32
  }
  func.func @transform_3(%arg0: i32) -> (i32, i32) {
    %c0_i32 = arith.constant 0 : i32
    %c0_i32_0 = arith.constant 0 : i32
    %c0_i32_1 = arith.constant 0 : i32
    return %c0_i32, %c0_i32_0 : i32, i32
  }
  func.func @transform_4(%arg0: i32) -> (i32, i32) {
    %c0_i32 = arith.constant 0 : i32
    %c0_i32_0 = arith.constant 0 : i32
    return %arg0, %c0_i32 : i32, i32
  }
}

</mosaic_0001>

<bundles_post_ra>
// kernel: tpu_custom_call.1
= control target key start
LH: loop header
LB: loop body
LE: loop exit
PB: predicated region body
PF: predicated region fallthrough
CT: control target
= control target key end

     0   :  { %9 = vsyncpa [#allocation3], 0  ;;  %s700_s0 = inlined_call_operand.vmem [shape: f32[16,128], index: 0, kind: input, shape index: {}]   ;;  %s701_s1 = inlined_call_operand.vmem [shape: f32[16,4], index: 1, kind: input, shape index: {}]   ;;  %s702_s2 = inlined_call_operand.hbm [shape: bf16[128,128], index: 2, kind: input, shape index: {}]   ;;  %s703_s3 = inlined_call_operand.vmem [shape: f32[4,128], index: 3, kind: input, shape index: {}]   ;;  %s704_s4 = inlined_call_operand.hbm [shape: f32[16,128], index: 4, kind: output, shape index: {}]  }
   0x1   :  { %10 = vsyncpa [#allocation4], 0  ;;  %s548_s15 = smov [#allocation2]   ;;  %s500_s19 = scalar_lea.hbm %s702_s2, 1024 }
   0x2   :  { %s20_s16 = sshll.u32 %s548_s15, 4  ;;  %p501_p0 = scmp.ne.s32.totalorder %s702_s2, %s500_s19  ;;  %s21_s16 = int_to_ptr.vmem [resolvable:$true] %s20_s16 }
   0x3   :  { %p504_p1 = scmp.lt.u32.totalorder %s500_s19, %s702_s2 }
   0x5   :  { %p506_p2 = pnand %p504_p1, %p501_p0 }
   0x7   :  { %509 = shalt.err (!%p506_p2)
}
   0x8   :  { %s510_s24 = scalar_lea.vmem %s21_s16, 1024  ;;  %p515_p4 = scmp.lt.s32.totalorder %s21_s16, %s21_s16 }
   0x9   :  { %p511_p3 = scmp.ne.s32.totalorder %s21_s16, %s510_s24  ;;  %p516_p5 = scmp.lt.s32.totalorder %s510_s24, %s510_s24 }
   0xb   :  { %p517_p6 = por %p516_p5, %p515_p4 }
   0xd   :  { %p518_p7 = pnand %p517_p6, %p511_p3 }
   0xf   :  { %521 = shalt.err (!%p518_p7)
}
  0x10   :  { %s549_s25 = smov 64   ;;  %s550_s26 = smov 4  }
  0x11   :  { %26 = dma.hbm_to_vmem [thread:$0]  %s702_s2, 1024, %s21_s16, [#allocation3], %s549_s25, %s549_s25, %s550_s26  }
  0x12   :  { %544 = dma.done.wait [#allocation3], 1024  }
  0x13   :  { %545 = vsyncadd [#allocation3], 4294966272  ;;  %v551_v0 = vmov 0.0   ;;  %v552_v1 = vmov 0   ;;  %v33_v2 = vld [vmem:[%s700_s0] sm:$0xff]  ;;  %v34_v4 = vld [vmem:[%s700_s0 + $0x8] sm:$0xff]  ;;  %v170_v35 = vlaneseq }
  0x14   :  { %429 = vmatprep.subr.bf16.mxu0 %v551_v0  ;;  %464 = vset.pattern.permute.xlu1 %v552_v1  ;;  %v607_v3 = vld [vmem:[%s701_s1] sm:$0xff]  ;;  %v616_v6 = vld [vmem:[%s701_s1 + $0x8] sm:$0xff]  ;;  %s553_s10 = smov 126   ;;  %v478_v10 = vld [vmem:[#allocation2 + $0x10] sm:$0xff]   ;;  %vm554_vm0 = vmmov 0   ;;  %v555_v23 = vmov 1  }
  0x15   :  { %463 = vset.pattern.permute.xlu0 %v552_v1  ;;  %v236_v5 = vmul.f32 0.5, %v607_v3  ;;  %v476_v7 = vld [vmem:[#allocation2] sm:$0xff]   ;;  %v237_v8 = vmul.f32 0.5, %v616_v6  ;;  %v477_v9 = vld [vmem:[#allocation2 + $0x8] sm:$0xff]   ;;  %v479_v11 = vld [vmem:[#allocation2 + $0x18] sm:$0xff]   ;;  %445 = vmatprep.mubr.msk.bf16.mxu0 %vm554_vm0, %v551_v0  ;;  %s556_s0 = smov 127  }
  0x16   :  { %54 = vmax.xlane.f32.xlu0 %v33_v2  ;;  %430 = vmatpush3.bf16.xpose.msra.mxu0 %v476_v7  ;;  %v480_v12 = vld [vmem:[#allocation2 + $0x20] sm:$0xff]   ;;  %v481_v13 = vld [vmem:[#allocation2 + $0x28] sm:$0xff]   ;;  %v482_v14 = vld [vmem:[#allocation2 + $0x30] sm:$0xff]   ;;  %v638_v37 = vshrl.u32 %v170_v35, 7 }
  0x17   :  { %240 = vrot.lane.b32.xlu1 %v236_v5, %s553_s10  ;;  %431 = vmatprep.subr.bf16.mxu0 %v551_v0  ;;  %v483_v15 = vld [vmem:[#allocation2 + $0x38] sm:$0xff]   ;;  %v635_v34 = vld [vmem:[%s703_s3] sm:$0xf]  ;;  %s559_s3 = smov [#allocation5]  }
  0x18   :  { %v250_v36 = vmul.f32 0.5, %v635_v34  ;;  %v646_v41 = vsub.s32 0, %v638_v37  ;;  %v656_v58 = vsub.s32 1, %v638_v37  ;;  %s400_s12 = sshll.u32 %s559_s3, 4  ;;  %s401_s12 = int_to_ptr.vmem [resolvable:$true] %s400_s12 }
  0x19   :  { %s522_s13 = scalar_lea.vmem %s401_s12, 256  ;;  %p527_p9 = scmp.lt.s32.totalorder %s401_s12, %s401_s12 }
  0x1a   :  { %56 = vmax.xlane.f32.xlu0 %v34_v4  ;;  %v252_v38 = vrot.slane %v250_v36, 2  ;;  %p523_p8 = scmp.ne.s32.totalorder %s401_s12, %s522_s13  ;;  %p528_p10 = scmp.lt.s32.totalorder %s522_s13, %s522_s13 }
  0x1b   :  { %242 = vrot.lane.b32.xlu1 %v237_v8, %s553_s10 }
  0x1c   :  { %v641_v39 = vadd.f32 %v252_v38, %v635_v34  ;;  %v649_v42 = vsub.f32 %v635_v34, %v252_v38  ;;  %v558_v38 = vmov 3   ;;  %p529_p11 = por %p528_p10, %p527_p9 }
  0x1e   :  { %432 = vmatpush3.bf16.xpose.msra.mxu0 %v477_v9  ;;  %v316_v44 = vrot.slane %v641_v39, %v646_v41  ;;  %v286_v45 = vrot.slane %v649_v42, %v646_v41  ;;  %p530_p12 = pnand %p529_p11, %p523_p8 }
  0x1f   :  { %433 = vmatprep.subr.bf16.mxu0 %v551_v0 }
  0x26   :  { %434 = vmatpush3.bf16.xpose.msra.mxu0 %v478_v10 }
  0x27   :  { %435 = vmatprep.subr.bf16.mxu0 %v551_v0 }
  0x2e   :  { %436 = vmatpush3.bf16.xpose.msra.mxu0 %v479_v11 }
  0x2f   :  { %437 = vmatprep.subr.bf16.mxu0 %v551_v0 }
  0x30   :  { %162 = vperm.xlu0 %463, %v607_v3  }
  0x36   :  { %438 = vmatpush3.bf16.xpose.msra.mxu0 %v480_v12 }
  0x37   :  { %439 = vmatprep.subr.bf16.mxu0 %v551_v0 }
  0x3e   :  { %440 = vmatpush3.bf16.xpose.msra.mxu0 %v481_v13 }
  0x3f   :  { %441 = vmatprep.subr.bf16.mxu0 %v551_v0 }
  0x46   :  { %442 = vmatpush3.bf16.xpose.msra.mxu0 %v482_v14 }
  0x47   :  { %443 = vmatprep.subr.bf16.mxu0 %v551_v0  ;;  %v300_v0 = vrot.slane %v649_v42, %v656_v58 }
  0x4e   :  { %444 = vmatpush3.bf16.xpose.msra.mxu0 %v483_v15 }
  0x89   :  { %v241_v16 = vpop.permute.xlu1 %240 }
  0x8a   :  { %v246_v17 = vsub.f32 %v607_v3, %v241_v16  ;;  %v248_v19 = vadd.f32 %v241_v16, %v607_v3 }
  0x8c   :  { %275 = vperm.xlu1 %464, %v246_v17   ;;  %v256_v22 = vsub.f32 %v248_v19, %v246_v17 }
  0x8d   :  { %v243_v18 = vpop.permute.xlu1 %242 }
  0x8e   :  { %v247_v20 = vsub.f32 %v616_v6, %v243_v18  ;;  %v249_v21 = vadd.f32 %v243_v18, %v616_v6 }
  0x90   :  { %280 = vperm.xlu1 %464, %v247_v20   ;;  %310 = vperm.xlu0 %463, %v249_v21   ;;  %v625_v30 = vsub.f32 %v249_v21, %v247_v20 }
  0x94   :  { %465 = vset.pattern.permute.xlu1 %v555_v23  ;;  %260 = vrot.lane.b32.xlu0 %v256_v22, %s556_s0 }
  0x95   :  { %290 = vperm.xlu1 %465, %v246_v17  }
  0x99   :  { %294 = vperm.xlu1 %465, %v247_v20  }
  0x9d   :  { %466 = vset.pattern.permute.xlu1 %v552_v1 }
  0x9e   :  { %305 = vperm.xlu1 %466, %v248_v19  }
  0xa2   :  { %467 = vset.pattern.permute.xlu1 %v555_v23 }
  0xa3   :  { %v55_v24 = vpop.xlane.xlu0 %54  ;;  %320 = vperm.xlu1 %467, %v248_v19  }
  0xa4   :  { %v58_v25 = vsub.f32 %v33_v2, %v55_v24  ;;  %v557_v2 = vmov 2  }
  0xa6   :  { %v60_v26 = vmul.f32 1.442695, %v58_v25 }
  0xa7   :  { %v57_v27 = vpop.xlane.xlu0 %56  ;;  %324 = vperm.xlu1 %467, %v249_v21  }
  0xa8   :  { %v59_v28 = vsub.f32 %v34_v4, %v57_v27  ;;  %484 = vpow2.f32 %v60_v26  ;;  %v330_v4 = vrot.slane %v641_v39, %v656_v58 }
  0xaa   :  { %v62_v29 = vmul.f32 1.442695, %v59_v28 }
  0xab   :  { %262 = vrot.lane.b32.xlu1 %v625_v30, %s556_s0 }
  0xac   :  { %486 = vpow2.f32 %v62_v29  ;;  %468 = vset.pattern.permute.xlu1 %v552_v1 }
  0xaf   :  { %167 = vperm.xlu1 %468, %v616_v6   ;;  %v643_v40 = vpop.permute.xlu0 %162 }
  0xb2   :  { %v485_v31 = vpop.eup %484 }
  0xb3   :  { %64 = vadd.xlane.f32.xlu0 %v485_v31  ;;  %470 = vset.pattern.permute.xlu1 %v555_v23 }
  0xb6   :  { %v487_v32 = vpop.eup %486 }
  0xb7   :  { %v70_v33 = vpack.c.bf16 %v487_v32, %v485_v31 }
  0xb9   :  { %446 = vmatmul.mubr.bf16.vlgmr.msra.gmra.mrb[0].mxu0 %v70_v33 }
  0xd3   :  { %66 = vadd.xlane.f32.xlu1 %v487_v32 }
  0xe4   :  { %183 = vperm.xlu1 %470, %v616_v6  }
  0xe8   :  { %471 = vset.pattern.permute.xlu1 %v552_v1 }
 0x10b   :  { %v276_v43 = vpop.permute.xlu1 %275 }
 0x10c   :  { %v287_v60 = vmax.f32 %v276_v43, %v286_v45  ;;  %v365_v61 = vmin.f32 %v276_v43, %v286_v45  ;;  %v268_v43 = vsub.f32 %v641_v39, %v649_v42 }
 0x10f   :  { %v281_v46 = vpop.permute.xlu1 %280  ;;  %v311_v47 = vpop.permute.xlu0 %310 }
 0x110   :  { %v288_v48 = vmax.f32 %v281_v46, %v286_v45  ;;  %v366_v49 = vmin.f32 %v281_v46, %v286_v45  ;;  %v318_v50 = vmin.f32 %v311_v47, %v316_v44  ;;  %v370_v51 = vmax.f32 %v311_v47, %v316_v44 }
 0x112   :  { %v334_v52 = vsub.f32 %v318_v50, %v288_v48  ;;  %v374_v53 = vsub.f32 %v370_v51, %v366_v49 }
 0x113   :  { %v261_v54 = vpop.permute.xlu0 %260 }
 0x114   :  { %v266_v55 = vmul.f32 %v261_v54, %v256_v22  ;;  %v291_v56 = vpop.permute.xlu1 %290  ;;  %v336_v28 = vmax.f32 %v334_v52, 0.0  ;;  %v376_v31 = vmax.f32 %v374_v53, 0.0 }
 0x115   :  { %v301_v9 = vmax.f32 %v291_v56, %v300_v0  ;;  %v367_v10 = vmin.f32 %v291_v56, %v300_v0 }
 0x116   :  { %345 = vperm.xlu0 %463, %v266_v55  }
 0x118   :  { %v295_v57 = vpop.permute.xlu1 %294 }
 0x119   :  { %v302_v15 = vmax.f32 %v295_v57, %v300_v0  ;;  %v368_v16 = vmin.f32 %v295_v57, %v300_v0  ;;  %v189_v0 = vrot.slane %v635_v34, %v656_v58 }
 0x11a   :  { %469 = vset.pattern.permute.xlu0 %v555_v23 }
 0x11b   :  { %179 = vperm.xlu0 %469, %v607_v3  }
 0x11d   :  { %v306_v59 = vpop.permute.xlu1 %305 }
 0x11e   :  { %v317_v62 = vmin.f32 %v306_v59, %v316_v44  ;;  %v369_v63 = vmax.f32 %v306_v59, %v316_v44  ;;  %v270_v44 = vrot.slane %v268_v43, 1 }
 0x11f   :  { %473 = vset.pattern.permute.xlu0 %v557_v2 }
 0x120   :  { %v333_v5 = vsub.f32 %v317_v62, %v287_v60  ;;  %v373_v7 = vsub.f32 %v369_v63, %v365_v61  ;;  %201 = vperm.xlu0 %473, %v616_v6   ;;  %v272_v47 = vmul.f32 %v270_v44, %v268_v43  ;;  %v206_v61 = vsub.s32 2, %v638_v37 }
 0x121   :  { %v173_v63 = vrot.slane %v635_v34, %v646_v41 }
 0x122   :  { %v321_v8 = vpop.permute.xlu1 %320  ;;  %v335_v17 = vmax.f32 %v333_v5, 0.0  ;;  %v375_v18 = vmax.f32 %v373_v7, 0.0  ;;  %v356_v50 = vrot.slane %v272_v47, %v646_v41  ;;  %v224_v7 = vsub.s32 3, %v638_v37 }
 0x123   :  { %v331_v11 = vmin.f32 %v321_v8, %v330_v4  ;;  %v371_v12 = vmax.f32 %v321_v8, %v330_v4  ;;  %v207_v8 = vrot.slane %v635_v34, %v206_v61 }
 0x124   :  { %475 = vset.pattern.permute.xlu0 %v552_v1 }
 0x125   :  { %v337_v13 = vsub.f32 %v331_v11, %v301_v9  ;;  %v377_v14 = vsub.f32 %v371_v12, %v367_v10  ;;  %v174_v9 = vsub.f32 %v643_v40, %v173_v63 }
 0x126   :  { %v325_v19 = vpop.permute.xlu1 %324 }
 0x127   :  { %v339_v20 = vmax.f32 %v337_v13, 0.0  ;;  %v379_v21 = vmax.f32 %v377_v14, 0.0  ;;  %v332_v22 = vmin.f32 %v325_v19, %v330_v4  ;;  %v372_v23 = vmax.f32 %v325_v19, %v330_v4 }
 0x129   :  { %v381_v24 = vmul.f32 %v379_v21, %v375_v18  ;;  %v338_v25 = vsub.f32 %v332_v22, %v302_v15  ;;  %v378_v26 = vsub.f32 %v372_v23, %v368_v16  ;;  %v341_v27 = vmul.f32 %v339_v20, %v335_v17 }
 0x12a   :  { %v263_v29 = vpop.permute.xlu1 %262  ;;  %v225_v17 = vrot.slane %v635_v34, %v224_v7  ;;  %v176_v18 = vand.u32 2147483647, %v174_v9 }
 0x12b   :  { %v340_v32 = vmax.f32 %v338_v25, 0.0  ;;  %v380_v1 = vmax.f32 %v378_v26, 0.0  ;;  %v267_v33 = vmul.f32 %v263_v29, %v625_v30  ;;  %488 = vrcp.f32 %v381_v24 }
 0x12d   :  { %v382_v35 = vmul.f32 %v380_v1, %v376_v31  ;;  %350 = vperm.xlu1 %471, %v267_v33   ;;  %v666_v36 = vmul.f32 %v340_v32, %v336_v28 }
 0x12e   :  { %v168_v54 = vpop.permute.xlu1 %167 }
 0x12f   :  { %v175_v13 = vsub.f32 %v168_v54, %v173_v63 }
 0x131   :  { %472 = vset.pattern.permute.xlu1 %v557_v2  ;;  %v177_v21 = vand.u32 2147483647, %v175_v13 }
 0x132   :  { %197 = vperm.xlu1 %472, %v607_v3  }
 0x136   :  { %474 = vset.pattern.permute.xlu1 %v558_v38 }
 0x137   :  { %215 = vperm.xlu1 %474, %v607_v3  }
 0x13b   :  { %219 = vperm.xlu1 %474, %v616_v6   ;;  %v489_v6 = vpop.eup %488 }
 0x140   :  { %v65_v49 = vpop.xlane.xlu0 %64 }
 0x160   :  { %v67_v39 = vpop.xlane.xlu1 %66 }
 0x164   :  { %v184_v59 = vpop.permute.xlu1 %183 }
 0x165   :  { %v191_v15 = vsub.f32 %v184_v59, %v189_v0 }
 0x167   :  { %v193_v22 = vand.u32 2147483647, %v191_v15 }
 0x169   :  { %v195_v31 = vadd.f32 %v193_v22, %v177_v21 }
 0x18c   :  { %v153_v45 = vpop.f32.mrb[0].mxu0 }
 0x18d   :  { %v447_v46 = vpop.f32.mrb[1].mxu0 }
 0x18e   :  { %v673_v30 = vpop.f32.mrb[2].mxu0 }
 0x18f   :  { %v448_v48 = vpop.f32.mrb[3].mxu0 }
 0x195   :  { %v346_v51 = vpop.permute.xlu0 %345 }
 0x196   :  { %v357_v52 = vadd.f32 %v356_v50, %v346_v51 }
 0x198   :  { %v359_v53 = vsub.f32 %v357_v52, %v341_v27 }
 0x19a   :  { %490 = vrcp.f32 %v359_v53  ;;  %v383_v3 = vsub.f32 %v381_v24, %v359_v53  ;;  %v180_v60 = vpop.permute.xlu0 %179 }
 0x19b   :  { %492 = vrcp.f32 %v382_v35  ;;  %v190_v4 = vsub.f32 %v180_v60, %v189_v0 }
 0x19c   :  { %v387_v55 = vmul.f32 %v489_v6, %v383_v3  ;;  %494 = vrcp.f32 %v65_v49 }
 0x19d   :  { %v192_v58 = vand.u32 2147483647, %v190_v4 }
 0x19f   :  { %v202_v41 = vpop.permute.xlu0 %201  ;;  %v194_v40 = vadd.f32 %v192_v58, %v176_v18 }
 0x1a0   :  { %v209_v37 = vsub.f32 %v202_v41, %v207_v8 }
 0x1a2   :  { %v211_v24 = vand.u32 2147483647, %v209_v37 }
 0x1a4   :  { %v491_v42 = vpop.eup %490 }
 0x1a5   :  { %v363_v56 = vmul.f32 %v491_v42, %v341_v27  ;;  %v493_v12 = vpop.eup %492 }
 0x1a6   :  { %v495_v27 = vpop.eup %494 }
 0x1a7   :  { %v389_v57 = vsub.f32 %v363_v56, %v387_v55  ;;  %v232_v32 = vmul.f32 %v495_v27, %v153_v45 }
 0x1ac   :  { %v351_v62 = vpop.permute.xlu1 %350 }
 0x1ad   :  { %v358_v2 = vadd.f32 %v356_v50, %v351_v62 }
 0x1af   :  { %v360_v5 = vsub.f32 %v358_v2, %v666_v36 }
 0x1b1   :  { %496 = vrcp.f32 %v360_v5  ;;  %v384_v10 = vsub.f32 %v382_v35, %v360_v5  ;;  %v198_v11 = vpop.permute.xlu1 %197  ;;  %v213_v35 = vadd.f32 %v211_v24, %v195_v31 }
 0x1b2   :  { %v208_v14 = vsub.f32 %v198_v11, %v207_v8  ;;  %498 = vrcp.f32 %v67_v39 }
 0x1b3   :  { %v388_v16 = vmul.f32 %v493_v12, %v384_v10 }
 0x1b4   :  { %v210_v19 = vand.u32 2147483647, %v208_v14 }
 0x1b6   :  { %v216_v20 = vpop.permute.xlu1 %215  ;;  %v212_v25 = vadd.f32 %v210_v19, %v194_v40 }
 0x1b7   :  { %v226_v23 = vsub.f32 %v216_v20, %v225_v17 }
 0x1b9   :  { %v228_v26 = vand.u32 2147483647, %v226_v23 }
 0x1ba   :  { %v220_v28 = vpop.permute.xlu1 %219 }
 0x1bb   :  { %v497_v29 = vpop.eup %496  ;;  %v230_v1 = vadd.f32 %v228_v26, %v212_v25  ;;  %v227_v33 = vsub.f32 %v220_v28, %v225_v17 }
 0x1bc   :  { %v364_v34 = vmul.f32 %v497_v29, %v666_v36  ;;  %v499_v44 = vpop.eup %498 }
 0x1bd   :  { %v234_v38 = vsub.f32 %v230_v1, %v232_v32  ;;  %v229_v43 = vand.u32 2147483647, %v227_v33  ;;  %v233_v47 = vmul.f32 %v499_v44, %v673_v30 }
 0x1be   :  { %v390_v46 = vsub.f32 %v364_v34, %v388_v16 }
 0x1bf   :  { %v391_v48 = vsub.f32 %v234_v38, %v389_v57  ;;  %v231_v49 = vadd.f32 %v229_v43, %v213_v35 }
 0x1c1   :  { %393 = vst [vmem:[#allocation5] sm:$0xff] %v391_v48  ;;  %v235_v50 = vsub.f32 %v231_v49, %v233_v47 }
 0x1c3   :  { %v392_v51 = vsub.f32 %v235_v50, %v390_v46 }
 0x1c5   :  { %394 = vst [vmem:[#allocation5 + $0x8] sm:$0xff] %v392_v51 }
 0x1c6   :  { %533 = shalt.err (!%p530_p12)
}
 0x1c7   :  { %s534_s16 = scalar_lea.hbm %s704_s4, 256 }
 0x1c8   :  { %p535_p13 = scmp.ne.s32.totalorder %s704_s4, %s534_s16  ;;  %p538_p0 = scmp.lt.u32.totalorder %s534_s16, %s704_s4 }
 0x1ca   :  { %p540_p1 = pnand %p538_p0, %p535_p13 }
 0x1cc   :  { %543 = shalt.err (!%p540_p1)
}
 0x1cd   :  { %s560_s21 = smov 128   ;;  %s561_s22 = smov 8  }
 0x1ce   :  { %406 = dma.vmem_to_hbm [thread:$0]  %s401_s12, 256, %s704_s4, [#allocation4], %s560_s21, %s560_s21, %s561_s22  }
 0x1cf   :  { %546 = dma.done.wait [#allocation4], 256  }
 0x1d0   :  { %547 = vsyncadd [#allocation4], 4294967040 }
 0x1d1   :  { %410 = vsyncpa [#allocation3], 1 }
 0x1d2   :  { %411 = vsyncpa [#allocation4], 1 }

</bundles_post_ra>
